<compile_context>
chip_gen: v5e
topology: v5e:2x2
jax: 0.10.0
libtpu: 0.0.40
codegen_flags: <defaults>
</compile_context>

<pallas_src>
import jax
import jax.numpy as jnp
from jax.experimental import pallas as pl
from jax.experimental.pallas import tpu as pltpu


# --------------------------------------------------------------------------
# Kernel: one MXU matmul per grid step on a packed (block-diagonal) weight.
# --------------------------------------------------------------------------
def _block_linear_kernel(x_ref, w_ref, b_ref, o_ref):
    # x_ref: (bt, K)      K = gp * in_per
    # w_ref: (1, K, N)    N = gp * out_per   (pre-transposed, block-diagonal)
    # b_ref: (1, N)
    # o_ref: (bt, N)
    acc = jnp.dot(x_ref[...], w_ref[0],
                  preferred_element_type=jnp.float32)          # (bt, N) f32
    o_ref[...] = (acc + b_ref[...].astype(jnp.float32)).astype(o_ref.dtype)


# --------------------------------------------------------------------------
# Hardware queries (trace-time, with conservative fallbacks).
# --------------------------------------------------------------------------
def _device_kind():
    try:
        return jax.devices()[0].device_kind.lower()
    except Exception:
        return ""


def _vmem_capacity_bytes():
    try:
        return int(pltpu.get_tpu_info().vmem_capacity_bytes)
    except Exception:
        kind = _device_kind()
        return (64 << 20) if "v7" in kind else (128 << 20)


def _mxu_pack_limit():
    # v6e / v7x MXUs are 256x256; v4 / v5e are 128x128.  Packing groups past
    # the MXU tile just burns FLOPs on zero blocks.
    kind = _device_kind()
    if "v6" in kind or "v7" in kind:
        return 256
    return 128


# --------------------------------------------------------------------------
# Tiling decisions.
# --------------------------------------------------------------------------
def _pick_groups_per_block(G, in_per, out_per, pack_limit):
    """Groups packed into one block-diagonal weight slab per grid step."""
    divisors = [d for d in range(G, 0, -1) if G % d == 0]
    # Largest divisor that fits the MXU tile and yields lane-dense blocks
    # (multiple of 128, or the full feature dim when d == G).
    for d in divisors:
        if d * in_per <= pack_limit and d * out_per <= pack_limit:
            if d == G or ((d * in_per) % 128 == 0 and (d * out_per) % 128 == 0):
                return d
    # Per-group dims are already big: plain per-group matmul (no zero padding).
    if in_per % 128 == 0 and out_per % 128 == 0:
        return 1
    # Fallback: full pack (block shapes equal the full feature dims -> legal).
    return G


def _choose_batch_tiling(B, K, N, itemsize, vmem_budget):
    """Return (bt, B_padded): bt divides B_padded; working set fits budget."""
    def step_bytes(bt):
        # double-buffered x/w/b/out blocks + the f32 matmul intermediate
        return 2 * (bt * K + K * N + N + bt * N) * itemsize + bt * N * 4

    if B <= 512 and step_bytes(B) <= vmem_budget:
        return B, B                       # full-dim block: always layout-legal
    for bt in (512, 256, 128, 64, 32, 16, 8):
        if step_bytes(bt) <= vmem_budget:
            return bt, -(-B // bt) * bt   # pad B up to a multiple of bt
    return 8, -(-B // 8) * 8


# --------------------------------------------------------------------------
# Wrapper.
# --------------------------------------------------------------------------
def block_linear(x, weight, bias, num_blocks, *, compute_dtype=None):
    """
    x:      (B, in_features)
    weight: (G, out_per, in_per)   -- PyTorch BlockLinear layout
    bias:   (G * out_per,)
    returns (B, G * out_per)
    """
    B, in_features = x.shape
    G, out_per, in_per = weight.shape
    assert G == num_blocks
    assert in_features == G * in_per
    out_features = G * out_per
    out_dtype = x.dtype

    # Optional bf16 compute path (MXU-native on all generations); accumulation
    # stays f32 inside the kernel via preferred_element_type.
    if compute_dtype is not None:
        x = x.astype(compute_dtype)
        weight = weight.astype(compute_dtype)
    itemsize = x.dtype.itemsize

    # ---- group packing: block-diagonal, pre-transposed weight ------------
    pack_limit = _mxu_pack_limit()
    gp = _pick_groups_per_block(G, in_per, out_per, pack_limit)
    num_gb = G // gp
    K = gp * in_per                       # per-step contraction width
    N = gp * out_per                      # per-step output width

    w_t = jnp.swapaxes(weight, 1, 2)      # (G, in_per, out_per), one-time XLA op
    if gp == 1:
        w_bd = w_t                        # (G, in_per, out_per): plain matmuls
    else:
        w_grp = w_t.reshape(num_gb, gp, in_per, out_per)
        eye = jnp.eye(gp, dtype=w_t.dtype)
        # (num_gb, gp, in_per, gp, out_per): group g on the diagonal.
        w_bd = jnp.einsum("bgio,gh->bgiho", w_grp, eye).reshape(num_gb, K, N)

    bias2d = bias.reshape(1, out_features).astype(jnp.float32)

    # ---- batch tiling + VMEM budgeting ------------------------------------
    vmem_cap = _vmem_capacity_bytes()
    vmem_budget = vmem_cap // 2           # headroom for Mosaic internal scratch
    bt, B_pad = _choose_batch_tiling(B, K, N, itemsize, vmem_budget)
    if B_pad != B:
        x = jnp.pad(x, ((0, B_pad - B), (0, 0)))
    num_bt = B_pad // bt

    step_bytes = 2 * (bt * K + K * N + N + bt * N) * itemsize + bt * N * 4
    cap_limit = (96 << 20) if vmem_cap >= (128 << 20) else (48 << 20)
    vmem_limit = int(min(cap_limit, max(2 * step_bytes, 16 << 20)))

    # Grid: group-blocks outer, batch-tiles inner -> weight & bias blocks are
    # resident across the whole batch sweep.  Both axes "parallel" so v7x can
    # shard across its 2 TensorCores (no-op on v5e/v6e).
    out = pl.pallas_call(
        _block_linear_kernel,
        out_shape=jax.ShapeDtypeStruct((B_pad, out_features), out_dtype),
        grid_spec=pltpu.PrefetchScalarGridSpec(
            num_scalar_prefetch=0,
            grid=(num_gb, num_bt),
            in_specs=[
                # Column slice of x for this group-block / batch-tile.
                pl.BlockSpec((bt, K), lambda gb, bi: (bi, gb)),
                # Packed block-diagonal weight slab (constant across batch tiles).
                pl.BlockSpec((1, K, N), lambda gb, bi: (gb, 0, 0)),
                # Bias slice (constant across batch tiles).
                pl.BlockSpec((1, N), lambda gb, bi: (0, gb)),
            ],
            out_specs=pl.BlockSpec((bt, N), lambda gb, bi: (bi, gb)),
        ),
        compiler_params=pltpu.CompilerParams(
            dimension_semantics=("parallel", "parallel"),
            vmem_limit_bytes=vmem_limit,
        ),
    )(x, w_bd, bias2d)

    if B_pad != B:
        out = out[:B]
    return out


# --------------------------------------------------------------------------
# Demo / correctness check.
# --------------------------------------------------------------------------
if __name__ == "__main__":
    batch = 8
    in_features = 256
    out_features = 256
    num_blocks = 4
    in_per = in_features // num_blocks
    out_per = out_features // num_blocks

    key = jax.random.PRNGKey(0)
    kx, kw = jax.random.split(key)

    # Deterministic init matching torch: randn * (2/(in+out))**0.5, zero bias.
    scale = (2.0 / (in_features + out_features)) ** 0.5
    weight = jax.random.normal(kw, (num_blocks, out_per, in_per), jnp.float32) * scale
    bias = jnp.zeros((out_features,), jnp.float32)

    x = jax.random.normal(kx, (batch, in_features), jnp.float32)

    out = block_linear(x, weight, bias, num_blocks)
    out = jax.block_until_ready(out)

    # Reference (pure JAX einsum, mirrors the torch forward).
    xg = x.reshape(batch, num_blocks, in_per)
    ref = jnp.einsum("bgi,goi->bgo", xg, weight).reshape(batch, -1) + bias
    assert out.shape == (batch, out_features)
    assert jnp.allclose(out, ref, atol=1e-5, rtol=1e-5)

    print("KERNEL_OK")
</pallas_src>

<mosaic_0001>
module attributes {stable_mosaic.version = 11 : i64} {
  func.func @_block_linear_kernel(%arg0: i32, %arg1: i32, %arg2: memref<8x128xf32, #tpu.memory_space<vmem>>, %arg3: memref<1x128x128xf32, #tpu.memory_space<vmem>>, %arg4: memref<1x128xf32, #tpu.memory_space<vmem>>, %arg5: memref<8x128xf32, #tpu.memory_space<vmem>>) attributes {dimension_semantics = [#tpu.dimension_semantics<parallel>, #tpu.dimension_semantics<parallel>], iteration_bounds = array<i64: 2, 1>, scalar_prefetch = 0 : i64, scratch_operands = 0 : i64, tpu.core_type = #tpu.core_type<tc>, window_params = [{transform_indices = @transform_0, window_bounds = array<i64: 8, 128>}, {transform_indices = @transform_1, window_bounds = array<i64: 1, 128, 128>}, {transform_indices = @transform_2, window_bounds = array<i64: 1, 128>}, {transform_indices = @transform_3, window_bounds = array<i64: 8, 128>}]} {
    %c0 = arith.constant 0 : index
    %c0_0 = arith.constant 0 : index
    %0 = vector.load %arg2[%c0, %c0_0] : memref<8x128xf32, #tpu.memory_space<vmem>>, vector<8x128xf32>
    %c0_1 = arith.constant 0 : index
    %c0_2 = arith.constant 0 : index
    %c0_3 = arith.constant 0 : index
    %1 = vector.load %arg3[%c0_1, %c0_2, %c0_3] : memref<1x128x128xf32, #tpu.memory_space<vmem>>, vector<1x128x128xf32>
    %2 = vector.shape_cast %1 : vector<1x128x128xf32> to vector<128x128xf32>
    %cst = arith.constant dense<0.000000e+00> : vector<8x128xf32>
    %3 = tpu.matmul %0, %2, %cst {dimension_numbers = #tpu.dot_dimension_numbers<[1], [0], [0], [1], [0, 0, 1, 1], [], []>} : vector<8x128xf32>, vector<128x128xf32>, vector<8x128xf32> -> vector<8x128xf32>
    %c0_4 = arith.constant 0 : index
    %c0_5 = arith.constant 0 : index
    %4 = vector.load %arg4[%c0_4, %c0_5] : memref<1x128xf32, #tpu.memory_space<vmem>>, vector<1x128xf32>
    %5 = vector.broadcast %4 : vector<1x128xf32> to vector<8x128xf32>
    %6 = arith.addf %3, %5 : vector<8x128xf32>
    %c0_6 = arith.constant 0 : index
    %c0_7 = arith.constant 0 : index
    %7 = vector.load %arg5[%c0_6, %c0_7] : memref<8x128xf32, #tpu.memory_space<vmem>>, vector<8x128xf32>
    tpu.vector_store %arg5[%c0_6, %c0_7], %6 {strides = array<i32>} : memref<8x128xf32, #tpu.memory_space<vmem>>, vector<8x128xf32>,
    return
  }
  func.func @transform_0(%arg0: i32, %arg1: i32) -> (i32, i32) {
    %c0_i32 = arith.constant 0 : i32
    return %arg1, %arg0 : i32, i32
  }
  func.func @transform_1(%arg0: i32, %arg1: i32) -> (i32, i32, i32) {
    %c0_i32 = arith.constant 0 : i32
    %c0_i32_0 = arith.constant 0 : i32
    %c0_i32_1 = arith.constant 0 : i32
    return %arg0, %c0_i32, %c0_i32_0 : i32, i32, i32
  }
  func.func @transform_2(%arg0: i32, %arg1: i32) -> (i32, i32) {
    %c0_i32 = arith.constant 0 : i32
    %c0_i32_0 = arith.constant 0 : i32
    return %c0_i32, %arg0 : i32, i32
  }
  func.func @transform_3(%arg0: i32, %arg1: i32) -> (i32, i32) {
    %c0_i32 = arith.constant 0 : i32
    return %arg1, %arg0 : i32, i32
  }
}

</mosaic_0001>

<bundles_post_ra>
// kernel: tpu_custom_call.1
= control target key start
LH: loop header
LB: loop body
LE: loop exit
PB: predicated region body
PF: predicated region fallthrough
CT: control target
= control target key end

     0   :  { %s943_s0 = inlined_call_operand.hbm [shape: f32[8,256], index: 0, kind: input, shape index: {}]   ;;  %s944_s1 = inlined_call_operand.hbm [shape: f32[2,128,128], index: 1, kind: input, shape index: {}]   ;;  %s945_s2 = inlined_call_operand.hbm [shape: f32[1,256], index: 2, kind: input, shape index: {}]   ;;  %s946_s3 = inlined_call_operand.hbm [shape: f32[8,256], index: 3, kind: output, shape index: {}]  }
   0x1   :  { %949 = sst [smem:[#allocation15_spill]] %s944_s1 }
   0x2   :  { %8 = vsyncpa [#allocation3], 0 }
   0x3   :  { %10 = vsyncpa [#allocation3 + $0x1], 0 }
   0x4   :  { %11 = vsyncpa [#allocation6], 0 }
   0x5   :  { %13 = vsyncpa [#allocation6 + $0x1], 0 }
   0x6   :  { %14 = vsyncpa [#allocation4], 0 }
   0x7   :  { %16 = vsyncpa [#allocation4 + $0x1], 0  ;;  %s754_s12 = smov 0   ;;  %s756_s13 = smov 0  }
   0x8   :  { %s758_s14 = smov 0   ;;  %s760_s15 = smov 0  }
   0x9   :  { %s762_s16 = smov 0   ;;  %s764_s17 = smov 0  }
   0xa LB: > { %950 = sst [smem:[#allocation12_spill]] %s718_s14  ;;  %s785_s18 = sadd.s32 4294967295, %s730_s17   ;;  %s730_s17 = sphi %s764_s17, %s22_s17   ;;  %s726_s16 = sphi %s762_s16, %s967_s16   ;;  %s722_s15 = sphi %s760_s15, %s966_s15   ;;  %s718_s14 = sphi %s758_s14, %s965_s14   ;;  %s714_s13 = sphi %s756_s13, %s964_s13   ;;  %s710_s12 = sphi %s754_s12, %s963_s12  }
   0xb   : > { %s462_s19 = sadd.s32 4294967294, %s730_s17   ;;  %s34_s20 = sadd.s32 1, %s726_s16 }
   0xc   : > { %s43_s21 = sadd.s32 1, %s718_s14  ;;  %p36_p0 = scmp.ge.s32.totalorder %s34_s20, 2 }
   0xd   : > { %p50_p1 = scmp.ne.s32.totalorder %s718_s14, %s714_s13  ;;  %p51_p2 = scmp.eq.s32.totalorder %s730_s17, 0 }
   0xe   : > { %p56_p3 = scmp.ne.s32.totalorder %s714_s13, %s710_s12  ;;  %s969_s20 = smov (%p36_p0, %s34_s20), 0 }
   0xf   : > { %951 = sst [smem:[#allocation13_spill]] %s969_s20  ;;  %p797_p4 = por %p51_p2, %p50_p1 }
  0x10   : > { %p57_p5 = scmp.eq.s32.totalorder %s785_s18, 0  ;;  %s39_s23 = ssub.s32 %s726_s16, %s969_s20 }
  0x11   : > { %p134_p6 = scmp.eq.s32.totalorder %s785_s18, 1  ;;  %p41_p7 = scmp.eq.s32.totalorder %s39_s23, 0 }
  0x12   : > { %p805_p8 = por %p57_p5, %p56_p3  ;;  %p140_p10 = scmp.eq.s32.totalorder %s462_s19, 1 }
  0x13   : > { %p809_p9 = por %p134_p6, %p50_p1  ;;  %p464_p12 = scmp.ge.s32.totalorder %s730_s17, 2 }
  0x14   : > { %s814_s26 = scalar_select %p41_p7, %s718_s14, %s43_s21  }
  0x15   : > { %p816_p11 = por %p140_p10, %p56_p3  ;;  %p501_p13 = scmp.lt.s32.totalorder %s730_s17, 2 }
  0x16   : > { %955 = sst [smem:[#allocation14_spill]] %s814_s26  ;;  %s823_s28 = sand.u32 1, %s718_s14  }
  0x17   : > { %s181_s29 = sand.u32 1, %s730_s17   ;;  %s467_s30 = sshll.u32 %s823_s28, 7 }
  0x18   : > { %p829_p0 = pnand %p501_p13, %p797_p4  ;;  %s478_s5 = sshll.u32 %s726_s16, 7 }
  0x19   : > { %s958_s1 = sld [smem:[#allocation15_spill]]  ;;  %s185_s10 = scalar_lea.vmem [#allocation5], %s467_s30 }
  0x1a   : > { %s193_s11 = sshll.u32 %s185_s10, 4  ;;  %s182_s19 = scalar_lea.sflag [#allocation6], %s181_s29  ;;  %s194_s11 = int_to_ptr.vmem [resolvable:$true] %s193_s11 }
  0x1b   : > { %s732_s21 = smov 128   ;;  %s733_s22 = smov 8  }
  0x1c   : > { %p470_p1 = scmp.ge.s32.totalorder %s730_s17, 1  ;;  %p218_p2 = scmp.lt.s32.totalorder %s730_s17, 3 }
  0x1d   : > { %s466_s30 = sshll.u32 %s726_s16, 3  ;;  %s206_s26 = scalar_lea.vmem [#allocation7], %s823_s28 }
  0x1e   : > { %p841_p3 = pnand %p470_p1, %p218_p2  ;;  %s170_s29 = scalar_lea.hbm %s943_s0, %s466_s30 }
  0x1f   : > { %s190_s8 = scalar_lea.hbm %s958_s1, %s478_s5  ;;  %s465_s5 = sshll.u32 %s823_s28, 3 }
  0x20   : > { %s191_s9 = sshll.u32 %s190_s8, 4  ;;  %s172_s8 = sshll.u32 %s170_s29, 4  ;;  %s192_s9 = int_to_ptr.hbm [resolvable:$true] %s191_s9  ;;  %s173_s8 = int_to_ptr.hbm [resolvable:$true] %s172_s8 }
  0x21   : > { %493 = dma.hbm_to_vmem [thread:$0]  (!%p829_p0), %s192_s9, 2048, %s194_s11, %s182_s19, %s732_s21, %s732_s21, %s733_s22  }
  0x22   : > { %s164_s10 = scalar_lea.vmem [#allocation2], %s465_s5  ;;  %s161_s9 = scalar_lea.sflag [#allocation3], %s823_s28 }
  0x23   : > { %s174_s1 = sshll.u32 %s164_s10, 4  ;;  %s209_s22 = scalar_lea.hbm %s945_s2, %s726_s16  ;;  %s175_s1 = int_to_ptr.vmem [resolvable:$true] %s174_s1 }
  0x24   : > { %490 = dma.hbm_to_vmem [thread:$0]  (!%p829_p0), %s173_s8, 128, %s175_s1, %s161_s9  }
  0x25   : > { %s211_s20 = sshll.u32 %s209_s22, 4  ;;  %s213_s14 = sshll.u32 %s206_s26, 4  ;;  %s212_s20 = int_to_ptr.hbm [resolvable:$true] %s211_s20  ;;  %s214_s14 = int_to_ptr.vmem [resolvable:$true] %s213_s14 }
  0x26   : > { %496 = dma.hbm_to_vmem [thread:$0]  (!%p829_p0), %s212_s20, 16, %s214_s14, %s182_s19  }
  0x27   : > { %222 = sbr.rel (%p841_p3) target bundleno = 211 (0xd3), region = 32  ;;  %s863_s5 = sand.u32 (!%p841_p3), 1, %s714_s13  }
  0x28   : > { %s471_s1 = sshll.u32 (!%p841_p3), %s863_s5, 3  ;;  %s225_s30 = scalar_lea.sflag (!%p841_p3), [#allocation3], %s863_s5 }
  0x29   : > { %s869_s6 = scalar_lea.vmem (!%p841_p3), [#allocation2], %s471_s1 }
  0x2c   : > { %697 = dma.done.wait (%p805_p8), %s225_s30, 128  }
  0x2d   : > { %699 = vsyncadd (%p805_p8), %s225_s30, 4294967168  ;;  %s234_s14 = sand.u32 1, %s785_s18   ;;  %s472_s20 = sshll.u32 %s863_s5, 7 }
  0x2e   : > { %s235_s26 = scalar_lea.sflag [#allocation6], %s234_s14  ;;  %s877_s28 = scalar_lea.vmem [#allocation5], %s472_s20 }
  0x2f   : > { %701 = dma.done.wait (%p805_p8), %s235_s26, 2064  }
  0x30   : > { %703 = vsyncadd (%p805_p8), %s235_s26, 4294965232  ;;  %v296_v0 = vld [vmem:[%s877_s28 + $0x78] sm:$0xff]  ;;  %v295_v1 = vld [vmem:[%s877_s28 + $0x70] sm:$0xff]  ;;  %s247_s18 = scalar_lea.vmem [#allocation7], %s863_s5  ;;  %s475_s24 = sshll.u32 %s722_s15, 3 }
  0x31   : > { %301 = vmatpush.msra.mxu0 %v296_v0  ;;  %v294_v2 = vld [vmem:[%s877_s28 + $0x68] sm:$0xff]  ;;  %v293_v3 = vld [vmem:[%s877_s28 + $0x60] sm:$0xff]  ;;  %v292_v4 = vld [vmem:[%s877_s28 + $0x58] sm:$0xff]  ;;  %s335_s23 = scalar_lea.hbm %s946_s3, %s475_s24  ;;  %s279_s7 = scalar_lea.vmem [#allocation8], %s471_s1 }
  0x32   : > { %v291_v5 = vld [vmem:[%s877_s28 + $0x50] sm:$0xff]  ;;  %v290_v6 = vld [vmem:[%s877_s28 + $0x48] sm:$0xff]  ;;  %v289_v7 = vld [vmem:[%s877_s28 + $0x40] sm:$0xff]  ;;  %s337_s29 = sshll.u32 %s279_s7, 4  ;;  %s339_s8 = sshll.u32 %s335_s23, 4  ;;  %s338_s29 = int_to_ptr.vmem [resolvable:$true] %s337_s29  ;;  %s340_s8 = int_to_ptr.hbm [resolvable:$true] %s339_s8 }
  0x33   : > { %302 = vmatpush.msra.mxu0 %v295_v1  ;;  %v288_v8 = vld [vmem:[%s877_s28 + $0x38] sm:$0xff]  ;;  %v287_v9 = vld [vmem:[%s877_s28 + $0x30] sm:$0xff]  ;;  %v286_v10 = vld [vmem:[%s877_s28 + $0x28] sm:$0xff]  ;;  %s323_s10 = scalar_lea.sflag [#allocation4], %s863_s5  ;;  %s658_s9 = sshra.s32 %s340_s8, 4  ;;  %s659_s9 = int_to_ptr.hbm [resolvable:$true] %s658_s9 }
  0x34   : > { %v285_v11 = vld [vmem:[%s877_s28 + $0x20] sm:$0xff]  ;;  %v284_v12 = vld [vmem:[%s877_s28 + $0x18] sm:$0xff]  ;;  %v283_v13 = vld [vmem:[%s877_s28 + $0x10] sm:$0xff]  ;;  %s660_s15 = scalar_lea.hbm %s659_s9, 8  ;;  %s664_s22 = scalar_lea.hbm %s946_s3, 16 }
  0x35   : > { %303 = vmatpush.msra.mxu0 %v294_v2  ;;  %v282_v14 = vld [vmem:[%s877_s28 + $0x8] sm:$0xff]  ;;  %v281_v15 = vld [vmem:[%s877_s28] sm:$0xff]  ;;  %v280_v16 = vld [vmem:[%s869_s6] sm:$0xff]  ;;  %p661_p4 = scmp.ne.s32.totalorder %s659_s9, %s660_s15  ;;  %p665_p7 = scmp.lt.s32.totalorder %s659_s9, %s946_s3 }
  0x36   : > { %v553_v17 = vld [vmem:[%s247_s18] ss:$0 sm:$0xff]  ;;  %p666_p8 = scmp.lt.s32.totalorder %s664_s22, %s660_s15 }
  0x37   : > { %304 = vmatpush.msra.mxu0 %v293_v3  ;;  %p662_p5 = pnand %p661_p4, %p809_p9 }
  0x38   : > { %p667_p10 = por %p666_p8, %p665_p7 }
  0x39   : > { %305 = vmatpush.msra.mxu0 %v292_v4  ;;  %p663_p6 = pneg %p662_p5 }
  0x3b   : > { %306 = vmatpush.msra.mxu0 %v291_v5  ;;  %p668_p13 = pnand %p667_p10, %p663_p6 }
  0x3d   : > { %307 = vmatpush.msra.mxu0 %v290_v6 }
  0x3f   : > { %308 = vmatpush.msra.mxu0 %v289_v7 }
  0x41   : > { %309 = vmatpush.msra.mxu0 %v288_v8 }
  0x43   : > { %310 = vmatpush.msra.mxu0 %v287_v9 }
  0x45   : > { %311 = vmatpush.msra.mxu0 %v286_v10 }
  0x47   : > { %312 = vmatpush.msra.mxu0 %v285_v11 }
  0x49   : > { %313 = vmatpush.msra.mxu0 %v284_v12 }
  0x4b   : > { %314 = vmatpush.msra.mxu0 %v283_v13 }
  0x4d   : > { %315 = vmatpush.msra.mxu0 %v282_v14 }
  0x4f   : > { %316 = vmatpush.msra.mxu0 %v281_v15 }
  0x50   : > { %317 = vmatmul.f32.vlgmr.msra.gmra.mxu0 %v280_v16 }
  0xcd   : > { %v318_v18 = vpop.f32.mrf.mxu0 }
  0xce   : > { %v319_v19 = vadd.f32 %v553_v17, %v318_v18 }
  0xd0   : > { %321 = vst [vmem:[%s279_s7] sm:$0xff] %v319_v19 }
  0xd1   : > { %671 = shalt.err (!%p668_p13)
}
  0xd2   : > { %485 = dma.vmem_to_hbm [thread:$0]  (%p809_p9), %s338_s29, 128, %s340_s8, %s323_s10  }
  0xd3 PF: > { %s351_s5 = sand.u32 1, %s710_s12   ;;  %p498_p0 = pnand %p464_p12, %p816_p11 }
  0xd4   : > { %s352_s6 = scalar_lea.sflag [#allocation4], %s351_s5 }
  0xd5   : > { %p499_p1 = pneg %p498_p0 }
  0xd7   : > { %705 = dma.done.wait (%p499_p1), %s352_s6, 128  }
  0xd8   : > { %707 = vsyncadd (%p499_p1), %s352_s6, 4294967168  ;;  %s22_s17 = sadd.s32 1, %s730_s17   ;;  %s960_s14 = sld [smem:[#allocation12_spill]] }
  0xd9   : > { %p19_p2 = scmp.ge.s32.totalorder %s22_s17, 4   ;;  %s961_s20 = sld [smem:[#allocation14_spill]] }
  0xda   : > { %s962_s25 = sld [smem:[#allocation13_spill]]  ;;  %s963_s12 = smov %s714_s13 }
  0xdb   : > { %s966_s15 = smov %s726_s16 }
  0xdc   :  { %21 = sbr.rel (!%p19_p2) target bundleno = 10 (0xa), region = 101 }
  0xde   : > { %s964_s13 = smov %s960_s14 }
  0xdf   : > { %s965_s14 = smov %s961_s20 }
  0xe0   : > { %s967_s16 = smov %s962_s25 }
  0xe1   :  { %358 = vsyncpa [#allocation3], 1 }
  0xe2   :  { %360 = vsyncpa [#allocation3 + $0x1], 1 }
  0xe3   :  { %361 = vsyncpa [#allocation6], 1 }
  0xe4   :  { %363 = vsyncpa [#allocation6 + $0x1], 1 }
  0xe5   :  { %364 = vsyncpa [#allocation4], 1 }
  0xe6   :  { %366 = vsyncpa [#allocation4 + $0x1], 1 }

</bundles_post_ra>
